<compile_context>
chip_gen: v7x
topology: tpu7x:2x2x1
jax: 0.10.0
libtpu: 0.0.40
codegen_flags: <defaults>
</compile_context>

<pallas_src>
import functools

import jax
import jax.numpy as jnp
from jax import lax
from jax.experimental import pallas as pl
from jax.experimental.pallas import tpu as pltpu

_LANES = 128
_MAX_BLOCK_ROWS = 2048      # 2048*128*4 B = 1 MiB f32 block per input
_EPS = 1e-6


def _cdiv(a, b):
    return -(-a // b)


def _round_up(x, m):
    return _cdiv(x, m) * m


def _dice_partials_kernel(logits_ref, targets_ref, part_ref,
                          acc_pt, acc_p, acc_t,
                          *, rows, block_rows, blocks_per_split, need_mask):
    c = pl.program_id(0)          # core-split index ("parallel")
    i = pl.program_id(1)          # row-block index within split ("arbitrary")

    @pl.when(i == 0)
    def _():
        zeros = jnp.zeros((8, _LANES), jnp.float32)
        acc_pt[...] = zeros
        acc_p[...] = zeros
        acc_t[...] = zeros

    # Hot path: loads + compares + vector adds only.
    p = logits_ref[...] < 0.0          # bool "predictions"
    t = targets_ref[...] != 0          # bool mask

    if need_mask:
        # Mask rows of this block that lie past the end of the array (Pallas
        # does not zero-fill out-of-bounds block reads). Phantom blocks of the
        # last split get valid_rows <= 0 -> fully masked.
        b = c * blocks_per_split + i
        valid_rows = rows - b * block_rows
        row_ids = lax.broadcasted_iota(jnp.int32, (block_rows, _LANES), 0)
        valid = row_ids < valid_rows
        p = jnp.logical_and(p, valid)
        t = jnp.logical_and(t, valid)

    pt = jnp.logical_and(p, t)

    # Reduce each block to an (8,128) partial with pure VPU adds (reduction
    # over the leading axis of (g,8,128) lowers to vector adds, no XLU).
    g = block_rows // 8
    acc_pt[...] += jnp.sum(pt.astype(jnp.float32).reshape(g, 8, _LANES), axis=0)
    acc_p[...] += jnp.sum(p.astype(jnp.float32).reshape(g, 8, _LANES), axis=0)
    acc_t[...] += jnp.sum(t.astype(jnp.float32).reshape(g, 8, _LANES), axis=0)

    @pl.when(i == pl.num_programs(1) - 1)
    def _():
        # One XLU full-reduce per accumulator, once per core split.
        part_ref[0, 0] = jnp.sum(acc_pt[...])
        part_ref[0, 1] = jnp.sum(acc_p[...])
        part_ref[0, 2] = jnp.sum(acc_t[...])


def binary_log_dice_loss(logits, targets, eps=_EPS):
    """logits: float array (any shape, native dtype); targets: boolean mask."""
    flat_logits = logits.reshape(-1)
    flat_targets = targets.astype(jnp.int8).reshape(-1)
    n = flat_logits.shape[0]

    rem = n % _LANES
    if rem:
        # TODO(synk): sizes not divisible by 128 take a small padded copy;
        # could instead be handled with element-level masking of a tail tile.
        pad = _LANES - rem
        flat_logits = jnp.pad(flat_logits, (0, pad), constant_values=1.0)  # p=0
        flat_targets = jnp.pad(flat_targets, (0, pad), constant_values=0)

    rows = flat_logits.shape[0] // _LANES
    logits2d = flat_logits.reshape(rows, _LANES)
    targets2d = flat_targets.reshape(rows, _LANES)

    # Block rows: full-extent block when small (always layout-legal), else a
    # multiple of 32 (legal for f32/bf16/int8 tiling) capped at _MAX_BLOCK_ROWS.
    if rows % 8 == 0 and rows <= _MAX_BLOCK_ROWS:
        block_rows = rows
    else:
        block_rows = min(_MAX_BLOCK_ROWS, _round_up(rows, 32))

    total_blocks = _cdiv(rows, block_rows)
    num_splits = 2 if total_blocks >= 2 else 1     # shard rows across v7x's 2 TCs
    blocks_per_split = _cdiv(total_blocks, num_splits)
    need_mask = (num_splits * blocks_per_split * block_rows != rows)

    def row_index(c, i):
        # Clamp phantom blocks of the last split back in bounds; their
        # contribution is zeroed by the in-kernel row mask anyway.
        b = jnp.minimum(c * blocks_per_split + i, total_blocks - 1)
        return (b, 0)

    kernel = functools.partial(
        _dice_partials_kernel,
        rows=rows,
        block_rows=block_rows,
        blocks_per_split=blocks_per_split,
        need_mask=need_mask)

    parts = pl.pallas_call(
        kernel,
        out_shape=jax.ShapeDtypeStruct((num_splits, 3), jnp.float32),
        grid_spec=pltpu.PrefetchScalarGridSpec(
            num_scalar_prefetch=0,
            grid=(num_splits, blocks_per_split),
            in_specs=[
                pl.BlockSpec((block_rows, _LANES), row_index),
                pl.BlockSpec((block_rows, _LANES), row_index),
            ],
            out_specs=pl.BlockSpec(
                (1, 3), lambda c, i: (c, 0),
                memory_space=pltpu.MemorySpace.SMEM),
            scratch_shapes=[pltpu.VMEM((8, _LANES), jnp.float32)] * 3,
        ),
        compiler_params=pltpu.CompilerParams(
            dimension_semantics=("parallel", "arbitrary")),
    )(logits2d, targets2d)

    # Combine per-core partials and finalize (trivial scalar work).
    s = jnp.sum(parts, axis=0)
    num = 2.0 * s[0]
    denom = s[1] + s[2]
    dice = jnp.clip((num + eps) / (denom + eps), eps, 1.0 - eps)
    return -jnp.log(dice)


def _reference(logits, targets, eps=_EPS):
    p = (logits < 0).astype(jnp.float32)
    t = targets.astype(jnp.float32)
    num = 2.0 * jnp.sum(p * t)
    denom = jnp.sum(p) + jnp.sum(t)
    dice = jnp.clip((num + eps) / (denom + eps), eps, 1.0 - eps)
    return -jnp.log(dice)


if __name__ == "__main__":
    key = jax.random.PRNGKey(0)
    k1, k2 = jax.random.split(key)
    # PyTorch conv-style NCHW input shape for the logits.
    logits = jax.random.normal(k1, (2, 4, 16, 16), dtype=jnp.float32)
    targets = jax.random.bernoulli(k2, p=0.5, shape=(2, 4, 16, 16))

    loss = binary_log_dice_loss(logits, targets)
    jax.block_until_ready(loss)

    ref = _reference(logits, targets)
    assert jnp.allclose(loss, ref, atol=1e-5, rtol=1e-5), (loss, ref)
    print("KERNEL_OK")
</pallas_src>

<mosaic_0001>
module attributes {stable_mosaic.version = 11 : i64} {
  func.func @_dice_partials_kernel(%arg0: i32, %arg1: i32, %arg2: memref<16x128xf32, #tpu.memory_space<vmem>>, %arg3: memref<16x128xi8, #tpu.memory_space<vmem>>, %arg4: memref<1x3xf32, #tpu.memory_space<smem>>, %arg5: memref<8x128xf32, #tpu.memory_space<vmem>>, %arg6: memref<8x128xf32, #tpu.memory_space<vmem>>, %arg7: memref<8x128xf32, #tpu.memory_space<vmem>>) attributes {dimension_semantics = [#tpu.dimension_semantics<parallel>, #tpu.dimension_semantics<arbitrary>], iteration_bounds = array<i64: 1, 1>, scalar_prefetch = 0 : i64, scratch_operands = 3 : i64, tpu.core_type = #tpu.core_type<tc>, window_params = [{transform_indices = @transform_0, window_bounds = array<i64: 16, 128>}, {transform_indices = @transform_1, window_bounds = array<i64: 16, 128>}, {transform_indices = @transform_2, window_bounds = array<i64: 1, 3>}]} {
    %c0_i32 = arith.constant 0 : i32
    %0 = arith.cmpi eq, %arg1, %c0_i32 : i32
    %1 = arith.extui %0 : i1 to i32
    %c0_i32_0 = arith.constant 0 : i32
    %2 = arith.cmpi ne, %1, %c0_i32_0 : i32
    scf.if %2 {
      %cst_21 = arith.constant 0.000000e+00 : f32
      %34 = vector.broadcast %cst_21 : f32 to vector<8x128xf32>
      %c0_22 = arith.constant 0 : index
      %c0_23 = arith.constant 0 : index
      %35 = vector.load %arg5[%c0_22, %c0_23] : memref<8x128xf32, #tpu.memory_space<vmem>>, vector<8x128xf32>
      tpu.vector_store %arg5[%c0_22, %c0_23], %34 {strides = array<i32>} : memref<8x128xf32, #tpu.memory_space<vmem>>, vector<8x128xf32>,
      %c0_24 = arith.constant 0 : index
      %c0_25 = arith.constant 0 : index
      %36 = vector.load %arg6[%c0_24, %c0_25] : memref<8x128xf32, #tpu.memory_space<vmem>>, vector<8x128xf32>
      tpu.vector_store %arg6[%c0_24, %c0_25], %34 {strides = array<i32>} : memref<8x128xf32, #tpu.memory_space<vmem>>, vector<8x128xf32>,
      %c0_26 = arith.constant 0 : index
      %c0_27 = arith.constant 0 : index
      %37 = vector.load %arg7[%c0_26, %c0_27] : memref<8x128xf32, #tpu.memory_space<vmem>>, vector<8x128xf32>
      tpu.vector_store %arg7[%c0_26, %c0_27], %34 {strides = array<i32>} : memref<8x128xf32, #tpu.memory_space<vmem>>, vector<8x128xf32>,
    } else {
    }
    %c0 = arith.constant 0 : index
    %c0_1 = arith.constant 0 : index
    %3 = vector.load %arg2[%c0, %c0_1] : memref<16x128xf32, #tpu.memory_space<vmem>>, vector<16x128xf32>
    %cst = arith.constant 0.000000e+00 : f32
    %4 = vector.broadcast %cst : f32 to vector<16x128xf32>
    %5 = arith.cmpf olt, %3, %4 : vector<16x128xf32>
    %c0_2 = arith.constant 0 : index
    %c0_3 = arith.constant 0 : index
    %6 = vector.load %arg3[%c0_2, %c0_3] : memref<16x128xi8, #tpu.memory_space<vmem>>, vector<16x128xi8>
    %c0_i8 = arith.constant 0 : i8
    %7 = vector.broadcast %c0_i8 : i8 to vector<16x128xi8>
    %8 = arith.cmpi ne, %6, %7 : vector<16x128xi8>
    %9 = arith.andi %5, %8 : vector<16x128xi1>
    %c0_4 = arith.constant 0 : index
    %c0_5 = arith.constant 0 : index
    %10 = vector.load %arg5[%c0_4, %c0_5] : memref<8x128xf32, #tpu.memory_space<vmem>>, vector<8x128xf32>
    %11 = arith.extui %9 : vector<16x128xi1> to vector<16x128xi32>
    %12 = arith.sitofp %11 : vector<16x128xi32> to vector<16x128xf32>
    %13 = vector.shape_cast %12 : vector<16x128xf32> to vector<2x8x128xf32>
    %cst_6 = arith.constant dense<0.000000e+00> : vector<8x128xf32>
    %14 = vector.multi_reduction <add>, %13, %cst_6 [0] : vector<2x8x128xf32> to vector<8x128xf32>
    %15 = arith.addf %10, %14 : vector<8x128xf32>
    %c0_7 = arith.constant 0 : index
    %c0_8 = arith.constant 0 : index
    %16 = vector.load %arg5[%c0_7, %c0_8] : memref<8x128xf32, #tpu.memory_space<vmem>>, vector<8x128xf32>
    tpu.vector_store %arg5[%c0_7, %c0_8], %15 {strides = array<i32>} : memref<8x128xf32, #tpu.memory_space<vmem>>, vector<8x128xf32>,
    %c0_9 = arith.constant 0 : index
    %c0_10 = arith.constant 0 : index
    %17 = vector.load %arg6[%c0_9, %c0_10] : memref<8x128xf32, #tpu.memory_space<vmem>>, vector<8x128xf32>
    %18 = arith.extui %5 : vector<16x128xi1> to vector<16x128xi32>
    %19 = arith.sitofp %18 : vector<16x128xi32> to vector<16x128xf32>
    %20 = vector.shape_cast %19 : vector<16x128xf32> to vector<2x8x128xf32>
    %cst_11 = arith.constant dense<0.000000e+00> : vector<8x128xf32>
    %21 = vector.multi_reduction <add>, %20, %cst_11 [0] : vector<2x8x128xf32> to vector<8x128xf32>
    %22 = arith.addf %17, %21 : vector<8x128xf32>
    %c0_12 = arith.constant 0 : index
    %c0_13 = arith.constant 0 : index
    %23 = vector.load %arg6[%c0_12, %c0_13] : memref<8x128xf32, #tpu.memory_space<vmem>>, vector<8x128xf32>
    tpu.vector_store %arg6[%c0_12, %c0_13], %22 {strides = array<i32>} : memref<8x128xf32, #tpu.memory_space<vmem>>, vector<8x128xf32>,
    %c0_14 = arith.constant 0 : index
    %c0_15 = arith.constant 0 : index
    %24 = vector.load %arg7[%c0_14, %c0_15] : memref<8x128xf32, #tpu.memory_space<vmem>>, vector<8x128xf32>
    %25 = arith.extui %8 : vector<16x128xi1> to vector<16x128xi32>
    %26 = arith.sitofp %25 : vector<16x128xi32> to vector<16x128xf32>
    %27 = vector.shape_cast %26 : vector<16x128xf32> to vector<2x8x128xf32>
    %cst_16 = arith.constant dense<0.000000e+00> : vector<8x128xf32>
    %28 = vector.multi_reduction <add>, %27, %cst_16 [0] : vector<2x8x128xf32> to vector<8x128xf32>
    %29 = arith.addf %24, %28 : vector<8x128xf32>
    %c0_17 = arith.constant 0 : index
    %c0_18 = arith.constant 0 : index
    %30 = vector.load %arg7[%c0_17, %c0_18] : memref<8x128xf32, #tpu.memory_space<vmem>>, vector<8x128xf32>
    tpu.vector_store %arg7[%c0_17, %c0_18], %29 {strides = array<i32>} : memref<8x128xf32, #tpu.memory_space<vmem>>, vector<8x128xf32>,
    %c0_i32_19 = arith.constant 0 : i32
    %31 = arith.cmpi eq, %arg1, %c0_i32_19 : i32
    %32 = arith.extui %31 : i1 to i32
    %c0_i32_20 = arith.constant 0 : i32
    %33 = arith.cmpi ne, %32, %c0_i32_20 : i32
    scf.if %33 {
      %c0_21 = arith.constant 0 : index
      %c0_22 = arith.constant 0 : index
      %34 = vector.load %arg5[%c0_21, %c0_22] : memref<8x128xf32, #tpu.memory_space<vmem>>, vector<8x128xf32>
      %35 = vector.shape_cast %34 : vector<8x128xf32> to vector<1x8x128xf32>
      %cst_23 = arith.constant dense<0.000000e+00> : vector<1xf32>
      %36 = vector.multi_reduction <add>, %35, %cst_23 [1, 2] : vector<1x8x128xf32> to vector<1xf32>
      %37 = vector.shape_cast %36 : vector<1xf32> to vector<1x1x1xf32>
      %38 = vector.extract %37[0, 0, 0] : f32 from vector<1x1x1xf32>
      %c0_24 = arith.constant 0 : index
      %c0_25 = arith.constant 0 : index
      %39 = memref.load %arg4[%c0_24, %c0_25] : memref<1x3xf32, #tpu.memory_space<smem>>
      memref.store %38, %arg4[%c0_24, %c0_25] : memref<1x3xf32, #tpu.memory_space<smem>>
      %c0_26 = arith.constant 0 : index
      %c0_27 = arith.constant 0 : index
      %40 = vector.load %arg6[%c0_26, %c0_27] : memref<8x128xf32, #tpu.memory_space<vmem>>, vector<8x128xf32>
      %41 = vector.shape_cast %40 : vector<8x128xf32> to vector<1x8x128xf32>
      %cst_28 = arith.constant dense<0.000000e+00> : vector<1xf32>
      %42 = vector.multi_reduction <add>, %41, %cst_28 [1, 2] : vector<1x8x128xf32> to vector<1xf32>
      %43 = vector.shape_cast %42 : vector<1xf32> to vector<1x1x1xf32>
      %44 = vector.extract %43[0, 0, 0] : f32 from vector<1x1x1xf32>
      %c0_29 = arith.constant 0 : index
      %c1 = arith.constant 1 : index
      %45 = memref.load %arg4[%c0_29, %c1] : memref<1x3xf32, #tpu.memory_space<smem>>
      memref.store %44, %arg4[%c0_29, %c1] : memref<1x3xf32, #tpu.memory_space<smem>>
      %c0_30 = arith.constant 0 : index
      %c0_31 = arith.constant 0 : index
      %46 = vector.load %arg7[%c0_30, %c0_31] : memref<8x128xf32, #tpu.memory_space<vmem>>, vector<8x128xf32>
      %47 = vector.shape_cast %46 : vector<8x128xf32> to vector<1x8x128xf32>
      %cst_32 = arith.constant dense<0.000000e+00> : vector<1xf32>
      %48 = vector.multi_reduction <add>, %47, %cst_32 [1, 2] : vector<1x8x128xf32> to vector<1xf32>
      %49 = vector.shape_cast %48 : vector<1xf32> to vector<1x1x1xf32>
      %50 = vector.extract %49[0, 0, 0] : f32 from vector<1x1x1xf32>
      %c0_33 = arith.constant 0 : index
      %c2 = arith.constant 2 : index
      %51 = memref.load %arg4[%c0_33, %c2] : memref<1x3xf32, #tpu.memory_space<smem>>
      memref.store %50, %arg4[%c0_33, %c2] : memref<1x3xf32, #tpu.memory_space<smem>>
    } else {
    }
    return
  }
  func.func @transform_0(%arg0: i32, %arg1: i32) -> (i32, i32) {
    %c1_i32 = arith.constant 1 : i32
    %0 = arith.muli %arg0, %c1_i32 : i32
    %1 = arith.addi %0, %arg1 : i32
    %c0_i32 = arith.constant 0 : i32
    %2 = arith.minsi %1, %c0_i32 : i32
    %c0_i32_0 = arith.constant 0 : i32
    %c0_i32_1 = arith.constant 0 : i32
    return %2, %c0_i32_0 : i32, i32
  }
  func.func @transform_1(%arg0: i32, %arg1: i32) -> (i32, i32) {
    %c1_i32 = arith.constant 1 : i32
    %0 = arith.muli %arg0, %c1_i32 : i32
    %1 = arith.addi %0, %arg1 : i32
    %c0_i32 = arith.constant 0 : i32
    %2 = arith.minsi %1, %c0_i32 : i32
    %c0_i32_0 = arith.constant 0 : i32
    %c0_i32_1 = arith.constant 0 : i32
    return %2, %c0_i32_0 : i32, i32
  }
  func.func @transform_2(%arg0: i32, %arg1: i32) -> (i32, i32) {
    %c0_i32 = arith.constant 0 : i32
    %c0_i32_0 = arith.constant 0 : i32
    return %arg0, %c0_i32 : i32, i32
  }
}

</mosaic_0001>

<bundles_post_ra>
// kernel: tpu_custom_call.1
= control target key start
LH: loop header
LB: loop body
LE: loop exit
PB: predicated region body
PF: predicated region fallthrough
CT: control target
= control target key end

     0   :  { %7 = vsyncpa [#allocation6], 0  ;;  %s308_s0 = inlined_call_operand.hbm [shape: f32[16,128], index: 0, kind: input, shape index: {}]   ;;  %s309_s1 = inlined_call_operand.hbm [shape: s8[16,128], index: 1, kind: input, shape index: {}]   ;;  %s310_s2 = inlined_call_operand.hbm [shape: f32[1,3], index: 2, kind: output, shape index: {}]  }
   0x1   :  { %8 = vsyncpa [#allocation9], 0 }
   0x2   :  { %9 = vsyncpa [#allocation7], 0  ;;  %s248_s9 = smov [#allocation5]   ;;  %s188_s13 = scalar_lea.hbm %s308_s0, 256 }
   0x3   :  { %s21_s10 = sshll.u32 %s248_s9, 4  ;;  %p189_p0 = scmp.ne.s32.totalorder %s308_s0, %s188_s13  ;;  %s22_s10 = int_to_ptr.vmem [resolvable:$true] %s21_s10 }
   0x4   :  { %p192_p1 = scmp.lt.u32.totalorder %s188_s13, %s308_s0 }
   0x6   :  { %p194_p2 = pnand %p192_p1, %p189_p0 }
   0x8   :  { %197 = shalt.err (!%p194_p2)
}
   0x9   :  { %s198_s18 = scalar_lea.vmem %s22_s10, 256  ;;  %p203_p4 = scmp.lt.s32.totalorder %s22_s10, %s22_s10 }
   0xa   :  { %p199_p3 = scmp.ne.s32.totalorder %s22_s10, %s198_s18  ;;  %p204_p5 = scmp.lt.s32.totalorder %s198_s18, %s198_s18 }
   0xc   :  { %p205_p6 = por %p204_p5, %p203_p4 }
   0xe   :  { %p206_p7 = pnand %p205_p6, %p199_p3 }
  0x10   :  { %209 = shalt.err (!%p206_p7)
}
  0x11   :  { %s249_s19 = smov 128   ;;  %s250_s20 = smov 8  }
  0x12   :  { %27 = dma.hbm_to_vmem [thread:$0]  %s308_s0, 256, %s22_s10, [#allocation6], %s249_s19, %s249_s19, %s250_s20  }
  0x13   :  { %s251_s23 = smov [#allocation8]   ;;  %s210_s27 = scalar_lea.hbm %s309_s1, 64 }
  0x14   :  { %s39_s24 = sshll.u32 %s251_s23, 4  ;;  %p211_p8 = scmp.ne.s32.totalorder %s309_s1, %s210_s27  ;;  %s40_s24 = int_to_ptr.vmem [resolvable:$true] %s39_s24 }
  0x15   :  { %p214_p9 = scmp.lt.u32.totalorder %s210_s27, %s309_s1 }
  0x17   :  { %p216_p10 = pnand %p214_p9, %p211_p8 }
  0x19   :  { %219 = shalt.err (!%p216_p10)
}
  0x1a   :  { %s220_s4 = scalar_lea.vmem %s40_s24, 64  ;;  %p225_p12 = scmp.lt.s32.totalorder %s40_s24, %s40_s24 }
  0x1b   :  { %p221_p11 = scmp.ne.s32.totalorder %s40_s24, %s220_s4  ;;  %p226_p13 = scmp.lt.s32.totalorder %s220_s4, %s220_s4 }
  0x1d   :  { %p227_p0 = por %p226_p13, %p225_p12 }
  0x1f   :  { %p228_p1 = pnand %p227_p0, %p221_p11 }
  0x21   :  { %231 = shalt.err (!%p228_p1)
}
  0x22   :  { %s252_s0 = smov 32   ;;  %s253_s5 = smov 2  }
  0x23   :  { %45 = dma.hbm_to_vmem [thread:$0]  %s309_s1, 64, %s40_s24, [#allocation9], %s252_s0, %s252_s0, %s253_s5  }
  0x24   :  { %242 = dma.done.wait [#allocation6], 256  }
  0x25   :  { %243 = vsyncadd [#allocation6], 4294967040 }
  0x26   :  { %244 = dma.done.wait [#allocation9], 64  }
  0x27   :  { %245 = vsyncadd [#allocation9], 4294967232  ;;  %v73_v0 = vld [vmem:[#allocation8] sm:$0x3]  ;;  %v74_v1 = vld [vmem:[#allocation8 + $0x2] sm:$0x3] }
  0x28   :  { %v69_v2 = vld [vmem:[#allocation5] sm:$0xff]  ;;  %vm75_vm0 = vnez %v73_v0  ;;  %vm76_vm1 = vnez %v74_v1  ;;  %v70_v3 = vld [vmem:[#allocation5 + $0x8] sm:$0xff]  ;;  %v254_v4 = vmov 0   ;;  %v255_v9 = vmov 0.0   ;;  %s232_s12 = scalar_lea.hbm %s310_s2, 16 }
  0x29   :  { %v77_v5 = vsel %vm75_vm0, 16843009, %v254_v4  ;;  %v78_v6 = vsel %vm76_vm1, 16843009, %v254_v4  ;;  %vm71_vm2 = vcmp.lt.f32.partialorder %v69_v2, 0.0  ;;  %vm72_vm3 = vcmp.lt.f32.partialorder %v70_v3, 0.0  ;;  %p233_p2 = scmp.ne.s32.totalorder %s310_s2, %s232_s12  ;;  %p236_p3 = scmp.lt.u32.totalorder %s232_s12, %s310_s2 }
  0x2a   :  { %v79_v7 = vunpack.c.0.s8 %v77_v5  ;;  %v80_v8 = vunpack.c.0.s8 %v78_v6  ;;  %v169_v15 = vsel %vm71_vm2, 1.0, %v255_v9  ;;  %v170_v16 = vsel %vm72_vm3, 1.0, %v255_v9 }
  0x2b   :  { %v98_v18 = vadd.f32 %v170_v16, %v169_v15  ;;  %p238_p4 = pnand %p236_p3, %p233_p2 }
  0x2c   :  { %vm81_vm4 = vcmp.ne.s32.totalorder %v79_v7, 0  ;;  %vm82_vm5 = vcmp.ne.s32.totalorder %v80_v8, 0 }
  0x2d   :  { %v171_v10 = vsel %vm81_vm4, 1.0, %v255_v9  ;;  %v172_v11 = vsel %vm82_vm5, 1.0, %v255_v9  ;;  %vm83_vm6 = vmand %vm71_vm2, %vm81_vm4 }
  0x2e   :  { %v106_v12 = vadd.f32 %v172_v11, %v171_v10  ;;  %vm84_vm7 = vmand %vm72_vm3, %vm82_vm5  ;;  %v167_v13 = vsel %vm83_vm6, 1.0, %v255_v9 }
  0x2f   :  { %v168_v14 = vsel %vm84_vm7, 1.0, %v255_v9 }
  0x30   :  { %137 = vadd.xlane.f32.xlu1 %v106_v12  ;;  %v90_v17 = vadd.f32 %v168_v14, %v167_v13 }
  0x32   :  { %113 = vadd.xlane.f32.xlu0 %v90_v17 }
  0x36   :  { %125 = vadd.xlane.f32.xlu0 %v98_v18 }
  0xbd   :  { %v138_v19 = vpop.xlane.xlu1 %137 }
  0xbe   :  { %v139_v20 = vrot.slane %v138_v19, 4 }
  0xbf   :  { %v114_v21 = vpop.xlane.xlu0 %113 }
  0xc0   :  { %v140_v22 = vadd.f32 %v139_v20, %v138_v19  ;;  %v115_v23 = vrot.slane %v114_v21, 4 }
  0xc2   :  { %v116_v24 = vadd.f32 %v115_v23, %v114_v21  ;;  %v141_v25 = vrot.slane %v140_v22, 2 }
  0xc3   :  { %v126_v26 = vpop.xlane.xlu0 %125 }
  0xc4   :  { %v117_v27 = vrot.slane %v116_v24, 2  ;;  %v127_v28 = vrot.slane %v126_v26, 4  ;;  %v142_v31 = vadd.f32 %v141_v25, %v140_v22 }
  0xc6   :  { %v128_v29 = vadd.f32 %v127_v28, %v126_v26  ;;  %v118_v30 = vadd.f32 %v117_v27, %v116_v24  ;;  %v143_v36 = vrot.slane %v142_v31, 1 }
  0xc8   :  { %v129_v32 = vrot.slane %v128_v29, 2  ;;  %v119_v33 = vrot.slane %v118_v30, 1  ;;  %v144_v39 = vadd.f32 %v143_v36, %v142_v31 }
  0xca   :  { %v130_v34 = vadd.f32 %v129_v32, %v128_v29  ;;  %v120_v35 = vadd.f32 %v119_v33, %v118_v30 }
  0xcc   :  { %173 = vpush %v120_v35  ;;  %v131_v37 = vrot.slane %v130_v34, 1 }
  0xce   :  { %v132_v38 = vadd.f32 %v131_v37, %v130_v34 }
  0xd0   :  { %175 = vpush %v132_v38 }
  0xd1   :  { %177 = vpush %v144_v39 }
  0xfd   :  { %s174_s1 = spop %173 }
  0xfe   :  { %123 = sst [smem:[#allocation10]] %s174_s1 }
 0x101   :  { %s176_s8 = spop %175 }
 0x102   :  { %135 = sst [smem:[#allocation10 + $0x1]] %s176_s8  ;;  %s178_s9 = spop %177 }
 0x103   :  { %147 = sst [smem:[#allocation10 + $0x2]] %s178_s9 }
 0x104   :  { %241 = shalt.err (!%p238_p4)
}
 0x105   :  { %s256_s17 = smov [#allocation10]  }
 0x106   :  { %155 = dma.smem_to_hbm %s256_s17, 16, %s310_s2, [#allocation7]  }
 0x107   :  { %246 = dma.done.wait [#allocation7], 16  }
 0x108   :  { %247 = vsyncadd [#allocation7], 4294967280 }
 0x109   :  { %159 = sfence }
 0x10a   :  { %160 = vsyncpa [#allocation6], 1 }
 0x10b   :  { %161 = vsyncpa [#allocation9], 1 }
 0x10c   :  { %162 = vsyncpa [#allocation7], 1 }

</bundles_post_ra>
